<compile_context>
chip_gen: v7x
topology: tpu7x:2x2x1
jax: 0.10.0
libtpu: 0.0.40
codegen_flags: <defaults>
</compile_context>

<pallas_src>
import functools
import math

import jax
import jax.numpy as jnp
from jax.experimental import pallas as pl
from jax.experimental.pallas import tpu as pltpu


_LANE = 128          # vreg lane width; the class axis is padded to this in VMEM
_NEG_BIG = -1.0e30   # finite "-inf" bias for padded class lanes


# --------------------------------------------------------------------------- #
# Kernels
# --------------------------------------------------------------------------- #
def _logsoftmax_kernel(x_ref, w_ref, b_ref, o_ref, *, num_classes):
    """Whole-F path.  x:[tb,F]  w:[F,c_pad]  b:[1,c_pad]  o:[tb,num_classes]."""
    # Inputs arrive in their storage dtype (f32 or bf16) — any narrowing cast is
    # done OUTSIDE the kernel so the HBM->VMEM DMA moves the narrow bytes.
    logits = jnp.dot(x_ref[...], w_ref[...],
                     preferred_element_type=jnp.float32) + b_ref[...]
    # Lane-dense (padded) log-softmax in VMEM. Padded lanes carry x@0 + (-1e30):
    # they never win the max and exp() underflows to 0 in the LSE.
    m = jnp.max(logits, axis=-1, keepdims=True)
    shifted = logits - m
    lse = jnp.log(jnp.sum(jnp.exp(shifted), axis=-1, keepdims=True))
    # Only the real classes go back to HBM (masked 16-lane store is far cheaper
    # than an 8x-padded writeback plus a separate slice pass).
    o_ref[...] = (shifted[:, :num_classes] - lse).astype(o_ref.dtype)


def _logsoftmax_ktiled_kernel(x_ref, w_ref, b_ref, o_ref, acc_ref, *,
                              num_classes):
    """K-tiled path for large F.  Grid = (batch 'parallel', F 'arbitrary')."""
    k = pl.program_id(1)

    @pl.when(k == 0)
    def _():
        acc_ref[...] = jnp.zeros_like(acc_ref)

    acc_ref[...] += jnp.dot(x_ref[...], w_ref[...],
                            preferred_element_type=jnp.float32)

    @pl.when(k == pl.num_programs(1) - 1)
    def _():
        logits = acc_ref[...] + b_ref[...]
        m = jnp.max(logits, axis=-1, keepdims=True)
        shifted = logits - m
        lse = jnp.log(jnp.sum(jnp.exp(shifted), axis=-1, keepdims=True))
        o_ref[...] = (shifted[:, :num_classes] - lse).astype(o_ref.dtype)


# --------------------------------------------------------------------------- #
# Parameter prep (one-time, NOT per forward pass)
# --------------------------------------------------------------------------- #
def prepare_params(weight, bias, *, param_dtype=jnp.float32):
    """weight:[C,F] (nn.Linear layout) -> w_fc:[F,c_pad]; bias:[C] -> b_pad:[1,c_pad].

    Padded classes get zero weights and a large negative bias so they never
    affect the max or the logsumexp.  param_dtype=bf16 halves the weight bytes
    and (via the wrapper's X cast) the streamed X bytes as well.
    """
    C, F = weight.shape
    c_pad = pl.cdiv(C, _LANE) * _LANE
    w_fc = jnp.zeros((F, c_pad), param_dtype).at[:, :C].set(
        weight.T.astype(param_dtype))
    b_pad = jnp.full((1, c_pad), _NEG_BIG, jnp.float32).at[0, :C].set(
        bias.astype(jnp.float32))
    return w_fc, b_pad


# --------------------------------------------------------------------------- #
# Tiling heuristics
# --------------------------------------------------------------------------- #
def _vmem_limit_bytes():
    # v5e/v6e: 128 MiB physical (default scoped limit only 16/32 MiB); v7x: 64 MiB.
    try:
        physical = pltpu.get_tpu_info().vmem_capacity_bytes
    except Exception:  # query unavailable -> assume smallest (v7x per-TC) VMEM
        physical = 64 << 20
    return (int(physical) * 3) // 4


def _pick_tile_b(B, f_resident, c_pad, num_classes, x_bytes, resident_bytes,
                 budget_bytes):
    per_row = (2 * f_resident * x_bytes    # double-buffered X block
               + 2 * num_classes * 4       # double-buffered output block
               + 4 * c_pad * 4)            # f32 logits / accumulator temporaries
    cap = (budget_bytes - resident_bytes) // max(per_row, 1)
    cap = int(min(max(cap, 8), 2048))      # diminishing returns past ~2k rows
    cap -= cap % 8
    if B <= min(cap, 1024):
        return B                           # single step: grid loop is pure overhead
    if B <= cap:
        # Split into two roughly equal steps so v7x's 2 TensorCores both work.
        half = ((B + 1) // 2 + 7) // 8 * 8
        return min(half, cap)
    return cap


def _pick_tile_f(F, c_pad, w_bytes, budget_bytes):
    """Largest multiple-of-128 divisor of F whose double-buffered weight block
    stays within ~1/4 of the VMEM budget.  None if F has no such divisor."""
    max_rows = max(_LANE, budget_bytes // 4 // max(1, 2 * c_pad * w_bytes))
    tf = min((max_rows // _LANE) * _LANE, (F // _LANE) * _LANE)
    while tf >= _LANE:
        if F % tf == 0:
            return tf
        tf -= _LANE
    return None


# --------------------------------------------------------------------------- #
# pallas_call builders
# --------------------------------------------------------------------------- #
def _forward_resident(x, w_fc, b_pad, num_classes, tile_b, grid_b, vmem_limit,
                      single_buffer_params):
    B, F = x.shape
    c_pad = w_fc.shape[1]
    kernel = functools.partial(_logsoftmax_kernel, num_classes=num_classes)
    if single_buffer_params:
        # Weight/bias never change across grid steps: one buffer is enough and
        # halves their VMEM footprint (matters most on v7x's 64 MiB VMEM).
        w_spec = pl.BlockSpec((F, c_pad), lambda i: (0, 0),
                              pipeline_mode=pl.Buffered(1))
        b_spec = pl.BlockSpec((1, c_pad), lambda i: (0, 0),
                              pipeline_mode=pl.Buffered(1))
    else:
        w_spec = pl.BlockSpec((F, c_pad), lambda i: (0, 0))
        b_spec = pl.BlockSpec((1, c_pad), lambda i: (0, 0))
    return pl.pallas_call(
        kernel,
        out_shape=jax.ShapeDtypeStruct((B, num_classes), jnp.float32),
        grid_spec=pltpu.PrefetchScalarGridSpec(
            num_scalar_prefetch=0,
            grid=(grid_b,),
            in_specs=[
                pl.BlockSpec((tile_b, F), lambda i: (i, 0)),  # streamed X tile
                w_spec,                                       # VMEM-resident weight
                b_spec,                                       # VMEM-resident bias
            ],
            out_specs=pl.BlockSpec((tile_b, num_classes), lambda i: (i, 0)),
        ),
        compiler_params=pltpu.CompilerParams(
            dimension_semantics=("parallel",),
            vmem_limit_bytes=vmem_limit),
    )(x, w_fc, b_pad)


def _forward_ktiled(x, w_fc, b_pad, num_classes, tile_b, grid_b, tile_f,
                    vmem_limit):
    B, F = x.shape
    c_pad = w_fc.shape[1]
    grid_k = F // tile_f
    kernel = functools.partial(_logsoftmax_ktiled_kernel,
                               num_classes=num_classes)
    return pl.pallas_call(
        kernel,
        out_shape=jax.ShapeDtypeStruct((B, num_classes), jnp.float32),
        grid_spec=pltpu.PrefetchScalarGridSpec(
            num_scalar_prefetch=0,
            grid=(grid_b, grid_k),
            in_specs=[
                pl.BlockSpec((tile_b, tile_f), lambda i, k: (i, k)),
                pl.BlockSpec((tile_f, c_pad), lambda i, k: (k, 0)),
                pl.BlockSpec((1, c_pad), lambda i, k: (0, 0)),
            ],
            out_specs=pl.BlockSpec((tile_b, num_classes), lambda i, k: (i, 0)),
            scratch_shapes=[pltpu.VMEM((tile_b, c_pad), jnp.float32)],
        ),
        compiler_params=pltpu.CompilerParams(
            dimension_semantics=("parallel", "arbitrary"),
            vmem_limit_bytes=vmem_limit),
    )(x, w_fc, b_pad)


# --------------------------------------------------------------------------- #
# Public forward pass
# --------------------------------------------------------------------------- #
def softmax_regressor2(x, w_fc, b_pad, num_classes, *, tile_b=None, tile_f=None):
    """log_softmax(x @ W.T + b, axis=1) for SoftmaxRegressor2.

    x:     [B, F]
    w_fc:  [F, c_pad] pre-transposed / class-padded weight (prepare_params)
    b_pad: [1, c_pad] class-padded f32 bias (prepare_params)
    returns [B, num_classes] float32 log-probabilities.
    """
    B, F = x.shape
    c_pad = w_fc.shape[1]
    w_bytes = jnp.dtype(w_fc.dtype).itemsize

    # Any narrowing (bf16) cast happens here, OUTSIDE the kernel, so the
    # streamed X DMA actually moves the narrow bytes.
    if x.dtype != w_fc.dtype:
        x = x.astype(w_fc.dtype)
    x_bytes = w_bytes

    vmem_limit = _vmem_limit_bytes()
    budget = (vmem_limit * 4) // 5  # leave headroom for compiler temporaries

    # Decide whether the weight can stay VMEM-resident or must be K-tiled.
    if tile_f is None and F * c_pad * w_bytes > budget // 2:
        tile_f = _pick_tile_f(F, c_pad, w_bytes, budget)
        # TODO(synk): if F is not a multiple of 128 no dividing K-tile exists;
        # zero-pad F upstream in prepare_params before enabling the K path.
    if tile_f is not None:
        assert F % tile_f == 0 and (tile_f == F or tile_f % _LANE == 0), (
            "tile_f must divide F and be a multiple of 128 (or equal F)")
    ktiled = tile_f is not None and tile_f < F

    if tile_b is None:
        if ktiled:
            resident = 2 * tile_f * c_pad * w_bytes + c_pad * 4
            tile_b = _pick_tile_b(B, tile_f, c_pad, num_classes, x_bytes,
                                  resident, budget)
        else:
            resident = F * c_pad * w_bytes + c_pad * 4
            tile_b = _pick_tile_b(B, F, c_pad, num_classes, x_bytes,
                                  resident, budget)
    tile_b = int(min(tile_b, B))
    if tile_b != B:
        tile_b = max(8, tile_b - tile_b % 8)  # sublane constraint
        tile_b = min(tile_b, B)
    grid_b = pl.cdiv(B, tile_b)
    # Note: when B % tile_b != 0 the padded rows of the last X block hold
    # uninitialized VMEM; exp/log there may produce Inf/NaN, but rows are
    # independent and the out-of-bounds output store is masked, so valid rows
    # are unaffected.  Do not "fix" this by reading those rows.

    if ktiled:
        return _forward_ktiled(x, w_fc, b_pad, num_classes, tile_b, grid_b,
                               tile_f, vmem_limit)
    try:
        return _forward_resident(x, w_fc, b_pad, num_classes, tile_b, grid_b,
                                 vmem_limit, single_buffer_params=True)
    except Exception:
        # This jax/Mosaic build rejected pipeline_mode=pl.Buffered(1); fall back
        # to the default double-buffered resident weight/bias (correctness and
        # everything else identical, just 2x the weight VMEM footprint).
        return _forward_resident(x, w_fc, b_pad, num_classes, tile_b, grid_b,
                                 vmem_limit, single_buffer_params=False)


# --------------------------------------------------------------------------- #
# Demo / self-test
# --------------------------------------------------------------------------- #
if __name__ == "__main__":
    batch, input_size, num_classes = 64, 32, 16

    key = jax.random.PRNGKey(0)
    kx, kw, kb, kx2, kw2, kb2 = jax.random.split(key, 6)

    # Deterministic init mimicking nn.Linear's default U(-1/sqrt(in), 1/sqrt(in)).
    bound = 1.0 / math.sqrt(input_size)
    weight = jax.random.uniform(kw, (num_classes, input_size), jnp.float32,
                                -bound, bound)
    bias = jax.random.uniform(kb, (num_classes,), jnp.float32, -bound, bound)
    x = jax.random.normal(kx, (batch, input_size), jnp.float32)
    ref = jax.nn.log_softmax(x @ weight.T + bias, axis=1)

    # One-time parameter prep (transpose + class padding) -- not per call.
    w_fc, b_pad = prepare_params(weight, bias)

    # 1) f32 path, auto tile -> single grid step for this small batch.
    out = jax.block_until_ready(softmax_regressor2(x, w_fc, b_pad, num_classes))
    assert out.shape == (batch, num_classes)
    assert jnp.allclose(out, ref, atol=1e-5, rtol=1e-5)

    # 2) Forced multi-step batch grid (exercises the pipelined path).
    out_tiled = jax.block_until_ready(
        softmax_regressor2(x, w_fc, b_pad, num_classes, tile_b=16))
    assert jnp.allclose(out_tiled, ref, atol=1e-5, rtol=1e-5)

    # 3) bf16-input path: the cast happens OUTSIDE the kernel (weights stored
    #    bf16, X cast in the wrapper) so streamed DMA bytes are actually halved.
    w_bf, b_bf = prepare_params(weight, bias, param_dtype=jnp.bfloat16)
    out_bf = jax.block_until_ready(
        softmax_regressor2(x, w_bf, b_bf, num_classes))
    assert jnp.allclose(out_bf, ref, atol=5e-2, rtol=5e-2)

    # 4) K-tiled large-F path (forced here with a small F=256, tile_f=128).
    input_size2 = 256
    bound2 = 1.0 / math.sqrt(input_size2)
    weight2 = jax.random.uniform(kw2, (num_classes, input_size2), jnp.float32,
                                 -bound2, bound2)
    bias2 = jax.random.uniform(kb2, (num_classes,), jnp.float32, -bound2, bound2)
    x2 = jax.random.normal(kx2, (batch, input_size2), jnp.float32)
    ref2 = jax.nn.log_softmax(x2 @ weight2.T + bias2, axis=1)
    w_fc2, b_pad2 = prepare_params(weight2, bias2)
    out2 = jax.block_until_ready(
        softmax_regressor2(x2, w_fc2, b_pad2, num_classes, tile_f=128))
    assert jnp.allclose(out2, ref2, atol=1e-5, rtol=1e-5)

    print("KERNEL_OK")
</pallas_src>

<mosaic_0001>
module attributes {stable_mosaic.version = 11 : i64} {
  func.func @_logsoftmax_kernel(%arg0: i32, %arg1: memref<64x32xf32, #tpu.memory_space<vmem>>, %arg2: memref<32x128xf32, #tpu.memory_space<vmem>>, %arg3: memref<1x128xf32, #tpu.memory_space<vmem>>, %arg4: memref<64x16xf32, #tpu.memory_space<vmem>>) attributes {dimension_semantics = [#tpu.dimension_semantics<parallel>], iteration_bounds = array<i64: 1>, scalar_prefetch = 0 : i64, scratch_operands = 0 : i64, tpu.core_type = #tpu.core_type<tc>, window_params = [{transform_indices = @transform_0, window_bounds = array<i64: 64, 32>}, {pipeline_mode = #tpu.pipeline_mode<synchronous>, transform_indices = @transform_1, window_bounds = array<i64: 32, 128>}, {pipeline_mode = #tpu.pipeline_mode<synchronous>, transform_indices = @transform_2, window_bounds = array<i64: 1, 128>}, {transform_indices = @transform_3, window_bounds = array<i64: 64, 16>}]} {
    %c0 = arith.constant 0 : index
    %c0_0 = arith.constant 0 : index
    %0 = vector.load %arg1[%c0, %c0_0] : memref<64x32xf32, #tpu.memory_space<vmem>>, vector<64x32xf32>
    %c0_1 = arith.constant 0 : index
    %c0_2 = arith.constant 0 : index
    %1 = vector.load %arg2[%c0_1, %c0_2] : memref<32x128xf32, #tpu.memory_space<vmem>>, vector<32x128xf32>
    %cst = arith.constant dense<0.000000e+00> : vector<64x128xf32>
    %2 = tpu.matmul %0, %1, %cst {dimension_numbers = #tpu.dot_dimension_numbers<[1], [0], [0], [1], [0, 0, 1, 1], [], []>} : vector<64x32xf32>, vector<32x128xf32>, vector<64x128xf32> -> vector<64x128xf32>
    %c0_3 = arith.constant 0 : index
    %c0_4 = arith.constant 0 : index
    %3 = vector.load %arg3[%c0_3, %c0_4] : memref<1x128xf32, #tpu.memory_space<vmem>>, vector<1x128xf32>
    %4 = vector.broadcast %3 : vector<1x128xf32> to vector<64x128xf32>
    %5 = arith.addf %2, %4 : vector<64x128xf32>
    %cst_5 = arith.constant dense<0xFF800000> : vector<64xf32>
    %6 = vector.multi_reduction <maximumf>, %5, %cst_5 [1] : vector<64x128xf32> to vector<64xf32>
    %7 = vector.shape_cast %6 : vector<64xf32> to vector<64x1xf32>
    %8 = vector.broadcast %7 : vector<64x1xf32> to vector<64x128xf32>
    %9 = arith.subf %5, %8 : vector<64x128xf32>
    %10 = math.exp %9 : vector<64x128xf32>
    %cst_6 = arith.constant dense<0.000000e+00> : vector<64xf32>
    %11 = vector.multi_reduction <add>, %10, %cst_6 [1] : vector<64x128xf32> to vector<64xf32>
    %12 = vector.shape_cast %11 : vector<64xf32> to vector<64x1xf32>
    %13 = math.log %12 : vector<64x1xf32>
    %14 = vector.extract_strided_slice %9 {offsets = [0, 0], sizes = [64, 16], strides = [1, 1]} : vector<64x128xf32> to vector<64x16xf32>
    %15 = vector.broadcast %13 : vector<64x1xf32> to vector<64x16xf32>
    %16 = arith.subf %14, %15 : vector<64x16xf32>
    %c0_7 = arith.constant 0 : index
    %c0_8 = arith.constant 0 : index
    %17 = vector.load %arg4[%c0_7, %c0_8] : memref<64x16xf32, #tpu.memory_space<vmem>>, vector<64x16xf32>
    tpu.vector_store %arg4[%c0_7, %c0_8], %16 {strides = array<i32>} : memref<64x16xf32, #tpu.memory_space<vmem>>, vector<64x16xf32>,
    return
  }
  func.func @transform_0(%arg0: i32) -> (i32, i32) {
    %c0_i32 = arith.constant 0 : i32
    %c0_i32_0 = arith.constant 0 : i32
    return %arg0, %c0_i32 : i32, i32
  }
  func.func @transform_1(%arg0: i32) -> (i32, i32) {
    %c0_i32 = arith.constant 0 : i32
    %c0_i32_0 = arith.constant 0 : i32
    %c0_i32_1 = arith.constant 0 : i32
    return %c0_i32, %c0_i32_0 : i32, i32
  }
  func.func @transform_2(%arg0: i32) -> (i32, i32) {
    %c0_i32 = arith.constant 0 : i32
    %c0_i32_0 = arith.constant 0 : i32
    %c0_i32_1 = arith.constant 0 : i32
    return %c0_i32, %c0_i32_0 : i32, i32
  }
  func.func @transform_3(%arg0: i32) -> (i32, i32) {
    %c0_i32 = arith.constant 0 : i32
    %c0_i32_0 = arith.constant 0 : i32
    return %arg0, %c0_i32 : i32, i32
  }
}

module attributes {stable_mosaic.version = 11 : i64} {
  func.func @_logsoftmax_kernel(%arg0: i32, %arg1: memref<64x32xf32, #tpu.memory_space<vmem>>, %arg2: memref<32x128xf32, #tpu.memory_space<vmem>>, %arg3: memref<1x128xf32, #tpu.memory_space<vmem>>, %arg4: memref<64x16xf32, #tpu.memory_space<vmem>>) attributes {dimension_semantics = [#tpu.dimension_semantics<parallel>], iteration_bounds = array<i64: 1>, scalar_prefetch = 0 : i64, scratch_operands = 0 : i64, tpu.core_type = #tpu.core_type<tc>, window_params = [{transform_indices = @transform_0, window_bounds = array<i64: 64, 32>}, {pipeline_mode = #tpu.pipeline_mode<synchronous>, transform_indices = @transform_1, window_bounds = array<i64: 32, 128>}, {pipeline_mode = #tpu.pipeline_mode<synchronous>, transform_indices = @transform_2, window_bounds = array<i64: 1, 128>}, {transform_indices = @transform_3, window_bounds = array<i64: 64, 16>}]} {
    %c0 = arith.constant 0 : index
    %c0_0 = arith.constant 0 : index
    %0 = vector.load %arg1[%c0, %c0_0] : memref<64x32xf32, #tpu.memory_space<vmem>>, vector<64x32xf32>
    %c0_1 = arith.constant 0 : index
    %c0_2 = arith.constant 0 : index
    %1 = vector.load %arg2[%c0_1, %c0_2] : memref<32x128xf32, #tpu.memory_space<vmem>>, vector<32x128xf32>
    %cst = arith.constant dense<0.000000e+00> : vector<64x128xf32>
    %2 = tpu.matmul %0, %1, %cst {dimension_numbers = #tpu.dot_dimension_numbers<[1], [0], [0], [1], [0, 0, 1, 1], [], []>} : vector<64x32xf32>, vector<32x128xf32>, vector<64x128xf32> -> vector<64x128xf32>
    %c0_3 = arith.constant 0 : index
    %c0_4 = arith.constant 0 : index
    %3 = vector.load %arg3[%c0_3, %c0_4] : memref<1x128xf32, #tpu.memory_space<vmem>>, vector<1x128xf32>
    %4 = vector.broadcast %3 : vector<1x128xf32> to vector<64x128xf32>
    %5 = arith.addf %2, %4 : vector<64x128xf32>
    %cst_5 = arith.constant dense<0xFF800000> : vector<64xf32>
    %6 = vector.multi_reduction <maximumf>, %5, %cst_5 [1] : vector<64x128xf32> to vector<64xf32>
    %7 = vector.shape_cast %6 : vector<64xf32> to vector<64x1xf32>
    %8 = vector.broadcast %7 : vector<64x1xf32> to vector<64x128xf32>
    %9 = arith.subf %5, %8 : vector<64x128xf32>
    %10 = math.exp %9 : vector<64x128xf32>
    %cst_6 = arith.constant dense<0.000000e+00> : vector<64xf32>
    %11 = vector.multi_reduction <add>, %10, %cst_6 [1] : vector<64x128xf32> to vector<64xf32>
    %12 = vector.shape_cast %11 : vector<64xf32> to vector<64x1xf32>
    %13 = math.log %12 : vector<64x1xf32>
    %14 = vector.extract_strided_slice %9 {offsets = [0, 0], sizes = [64, 16], strides = [1, 1]} : vector<64x128xf32> to vector<64x16xf32>
    %15 = vector.broadcast %13 : vector<64x1xf32> to vector<64x16xf32>
    %16 = arith.subf %14, %15 : vector<64x16xf32>
    %c0_7 = arith.constant 0 : index
    %c0_8 = arith.constant 0 : index
    %17 = vector.load %arg4[%c0_7, %c0_8] : memref<64x16xf32, #tpu.memory_space<vmem>>, vector<64x16xf32>
    tpu.vector_store %arg4[%c0_7, %c0_8], %16 {strides = array<i32>} : memref<64x16xf32, #tpu.memory_space<vmem>>, vector<64x16xf32>,
    return
  }
  func.func @transform_0(%arg0: i32) -> (i32, i32) {
    %c0_i32 = arith.constant 0 : i32
    %c0_i32_0 = arith.constant 0 : i32
    return %arg0, %c0_i32 : i32, i32
  }
  func.func @transform_1(%arg0: i32) -> (i32, i32) {
    %c0_i32 = arith.constant 0 : i32
    %c0_i32_0 = arith.constant 0 : i32
    %c0_i32_1 = arith.constant 0 : i32
    return %c0_i32, %c0_i32_0 : i32, i32
  }
  func.func @transform_2(%arg0: i32) -> (i32, i32) {
    %c0_i32 = arith.constant 0 : i32
    %c0_i32_0 = arith.constant 0 : i32
    %c0_i32_1 = arith.constant 0 : i32
    return %c0_i32, %c0_i32_0 : i32, i32
  }
  func.func @transform_3(%arg0: i32) -> (i32, i32) {
    %c0_i32 = arith.constant 0 : i32
    %c0_i32_0 = arith.constant 0 : i32
    return %arg0, %c0_i32 : i32, i32
  }
}

</mosaic_0001>

<bundles_post_ra>
// kernel: tpu_custom_call.1
= control target key start
LH: loop header
LB: loop body
LE: loop exit
PB: predicated region body
PF: predicated region fallthrough
CT: control target
= control target key end

     0   :  { %vm33_vm0 = vcmask 261120   ;;  %vm243_vm1 = vcmask 130048   ;;  %s472_s1 = inlined_call_operand.vmem [shape: f32[32,128], index: 1, kind: input, shape index: {}]   ;;  %s473_s0 = inlined_call_operand.vmem [shape: f32[64,32], index: 0, kind: input, shape index: {}]   ;;  %s474_s2 = inlined_call_operand.vmem [shape: f32[1,128], index: 2, kind: input, shape index: {}]   ;;  %s475_s3 = inlined_call_operand.vmem [shape: f32[64,16], index: 3, kind: output, shape index: {}]  }
   0x1   :  { %v22_v0 = vld [vmem:[%s472_s1] sm:$0xff]  ;;  %v23_v1 = vld [vmem:[%s472_s1 + $0x8] sm:$0xff]  ;;  %v24_v2 = vld [vmem:[%s472_s1 + $0x10] sm:$0xff] }
   0x2   :  { %v297_v3 = vpack.c.bf16 %v23_v1, %v22_v0  ;;  %v25_v4 = vld [vmem:[%s472_s1 + $0x18] sm:$0xff]  ;;  %v14_v5 = vld [vmem:[%s473_s0] sm:$0xff]  ;;  %v15_v8 = vld [vmem:[%s473_s0 + $0x8] sm:$0xff] }
   0x3   :  { %v18_v6 = vld [vmem:[%s473_s0 + $0x20] sm:$0xff]  ;;  %v301_v7 = vpack.c.bf16 %v25_v4, %v24_v2  ;;  %285 = vmatprep.mubr.msk.f32.mxu0 %vm33_vm0, %v14_v5  ;;  %v19_v9 = vld [vmem:[%s473_s0 + $0x28] sm:$0xff]  ;;  %v16_v10 = vld [vmem:[%s473_s0 + $0x10] sm:$0xff] }
   0x4   :  { %291 = vmatprep.mubr.msk.f32.mxu1 %vm33_vm0, %v18_v6  ;;  %298 = vmatprep.subr.bf16.mxu0 %v297_v3  ;;  %v20_v11 = vld [vmem:[%s473_s0 + $0x30] sm:$0xff]  ;;  %v17_v12 = vld [vmem:[%s473_s0 + $0x18] sm:$0xff]  ;;  %v256_v14 = vld [vmem:[%s474_s2] ss:$0 sm:$0xff] }
   0x5   :  { %305 = vmatprep.subr.bf16.mxu1 %v297_v3  ;;  %300 = vmatpush3.bf16.msra.mxu0 %v297_v3  ;;  %v21_v13 = vld [vmem:[%s473_s0 + $0x38] sm:$0xff] }
   0x6   :  { %307 = vmatpush3.bf16.msra.mxu1 %v297_v3  ;;  %302 = vmatprep.subr.bf16.mxu0 %v301_v7 }
   0x7   :  { %306 = vmatprep.subr.bf16.mxu1 %v301_v7 }
   0x9   :  { %304 = vmatpush3.bf16.msra.mxu0 %v301_v7 }
   0xa   :  { %308 = vmatpush3.bf16.msra.mxu1 %v301_v7 }
   0xc   :  { %286 = vmatmul.mubr.msk.f32.vlgmr.msra.gmra.mrb[0].mxu0 %vm33_vm0, %v15_v8 }
   0xd   :  { %292 = vmatmul.mubr.msk.f32.vlgmr.msra.gmra.mrb[0].mxu1 %vm33_vm0, %v19_v9  ;;  %288 = vmatprep.mubr.msk.f32.mxu0 %vm33_vm0, %v16_v10 }
   0xe   :  { %294 = vmatprep.mubr.msk.f32.mxu1 %vm33_vm0, %v20_v11 }
  0x10   :  { %289 = vmatmul.mubr.msk.f32.gmra.mrb[2].mxu0 %vm33_vm0, %v17_v12 }
  0x11   :  { %295 = vmatmul.mubr.msk.f32.gmra.mrb[2].mxu1 %vm33_vm0, %v21_v13 }
  0xdf   :  { %v287_v15 = vpop.f32.mrb[0].mxu0 }
  0xe0   :  { %v293_v16 = vpop.f32.mrb[0].mxu1  ;;  %v130_v17 = vadd.f32 %v287_v15, %v256_v14  ;;  %v124_v19 = vpop.f32.mrb[1].mxu0 }
  0xe1   :  { %v150_v18 = vadd.f32 %v293_v16, %v256_v14  ;;  %v144_v20 = vpop.f32.mrb[1].mxu1  ;;  %v125_v23 = vadd.f32 %v256_v14, %v124_v19 }
  0xe2   :  { %165 = vmax.xlane.f32.xlu0 %v130_v17  ;;  %v145_v28 = vadd.f32 %v256_v14, %v144_v20 }
  0xe3   :  { %173 = vmax.xlane.f32.xlu1 %v150_v18  ;;  %v290_v21 = vpop.f32.mrb[2].mxu0 }
  0xe4   :  { %v296_v22 = vpop.f32.mrb[2].mxu1  ;;  %v140_v24 = vadd.f32 %v290_v21, %v256_v14  ;;  %v134_v25 = vpop.f32.mrb[3].mxu0 }
  0xe5   :  { %v154_v26 = vpop.f32.mrb[3].mxu1  ;;  %v135_v27 = vadd.f32 %v256_v14, %v134_v25  ;;  %v160_v29 = vadd.f32 %v296_v22, %v256_v14 }
  0xe6   :  { %163 = vmax.xlane.f32.xlu0 %v125_v23  ;;  %v155_v30 = vadd.f32 %v256_v14, %v154_v26 }
  0xe7   :  { %169 = vmax.xlane.f32.xlu1 %v140_v24 }
  0xea   :  { %171 = vmax.xlane.f32.xlu0 %v145_v28 }
  0xeb   :  { %167 = vmax.xlane.f32.xlu1 %v135_v27 }
  0xee   :  { %175 = vmax.xlane.f32.xlu0 %v155_v30 }
  0xef   :  { %177 = vmax.xlane.f32.xlu1 %v160_v29 }
 0x16f   :  { %v166_v32 = vpop.xlane.xlu0 %165 }
 0x170   :  { %v174_v31 = vpop.xlane.xlu1 %173  ;;  %v410_v34 = vsub.f32 %v130_v17, %v166_v32 }
 0x171   :  { %v408_v33 = vsub.f32 %v150_v18, %v174_v31 }
 0x172   :  { %v189_v35 = vmul.f32 1.442695, %v410_v34 }
 0x173   :  { %v164_v37 = vpop.xlane.xlu0 %163  ;;  %v197_v38 = vmul.f32 1.442695, %v408_v33 }
 0x174   :  { %v170_v36 = vpop.xlane.xlu1 %169  ;;  %v416_v40 = vsub.f32 %v125_v23, %v164_v37  ;;  %309 = vpow2.f32 %v189_v35 }
 0x175   :  { %v414_v39 = vsub.f32 %v140_v24, %v170_v36  ;;  %311 = vpow2.f32 %v197_v38 }
 0x176   :  { %v187_v41 = vmul.f32 1.442695, %v416_v40 }
 0x177   :  { %v172_v43 = vpop.xlane.xlu0 %171  ;;  %v193_v44 = vmul.f32 1.442695, %v414_v39 }
 0x178   :  { %v168_v42 = vpop.xlane.xlu1 %167  ;;  %v420_v45 = vsub.f32 %v145_v28, %v172_v43  ;;  %313 = vpow2.f32 %v187_v41 }
 0x179   :  { %v422_v46 = vsub.f32 %v135_v27, %v168_v42  ;;  %315 = vpow2.f32 %v193_v44 }
 0x17a   :  { %v195_v47 = vmul.f32 1.442695, %v420_v45 }
 0x17b   :  { %v176_v49 = vpop.xlane.xlu0 %175  ;;  %v191_v51 = vmul.f32 1.442695, %v422_v46 }
 0x17c   :  { %v178_v48 = vpop.xlane.xlu1 %177  ;;  %317 = vpow2.f32 %v195_v47  ;;  %v428_v52 = vsub.f32 %v155_v30, %v176_v49 }
 0x17d   :  { %v425_v50 = vsub.f32 %v160_v29, %v178_v48 }
 0x17e   :  { %v310_v54 = vpop.eup %309  ;;  %v199_v55 = vmul.f32 1.442695, %v428_v52 }
 0x17f   :  { %v201_v53 = vmul.f32 1.442695, %v425_v50  ;;  %205 = vadd.xlane.f32.xlu1 %v310_v54  ;;  %v312_v56 = vpop.eup %311 }
 0x181   :  { %319 = vpow2.f32 %v201_v53 }
 0x182   :  { %321 = vpow2.f32 %v191_v51  ;;  %v314_v57 = vpop.eup %313 }
 0x183   :  { %213 = vadd.xlane.f32.xlu1 %v312_v56  ;;  %203 = vadd.xlane.f32.xlu0 %v314_v57  ;;  %323 = vpow2.f32 %v199_v55  ;;  %v316_v58 = vpop.eup %315 }
 0x186   :  { %v318_v59 = vpop.eup %317 }
 0x187   :  { %209 = vadd.xlane.f32.xlu1 %v316_v58  ;;  %211 = vadd.xlane.f32.xlu0 %v318_v59 }
 0x18b   :  { %v320_v60 = vpop.eup %319 }
 0x18c   :  { %v322_v61 = vpop.eup %321  ;;  %217 = vadd.xlane.f32.xlu1 %v320_v60 }
 0x18d   :  { %207 = vadd.xlane.f32.xlu0 %v322_v61  ;;  %v324_v62 = vpop.eup %323 }
 0x191   :  { %215 = vadd.xlane.f32.xlu0 %v324_v62 }
 0x20c   :  { %v206_v63 = vpop.xlane.xlu1 %205 }
 0x20d   :  { %325 = vlog2.f32 %v206_v63 }
 0x210   :  { %v214_v0 = vpop.xlane.xlu1 %213  ;;  %v204_v1 = vpop.xlane.xlu0 %203 }
 0x211   :  { %327 = vlog2.f32 %v214_v0 }
 0x212   :  { %329 = vlog2.f32 %v204_v1 }
 0x214   :  { %v210_v2 = vpop.xlane.xlu1 %209  ;;  %v212_v3 = vpop.xlane.xlu0 %211 }
 0x215   :  { %331 = vlog2.f32 %v210_v2 }
 0x216   :  { %333 = vlog2.f32 %v212_v3 }
 0x217   :  { %v326_v4 = vpop.eup %325 }
 0x218   :  { %v222_v5 = vmul.f32 0.6931472, %v326_v4 }
 0x219   :  { %v218_v6 = vpop.xlane.xlu1 %217 }
 0x21a   :  { %v208_v7 = vpop.xlane.xlu0 %207  ;;  %335 = vlog2.f32 %v218_v6  ;;  %v236_v8 = vsub.f32 %v410_v34, %v222_v5 }
 0x21b   :  { %337 = vlog2.f32 %v208_v7  ;;  %v328_v9 = vpop.eup %327 }
 0x21c   :  { %v330_v10 = vpop.eup %329  ;;  %245 = vst.msk [vmem:[%s475_s3 + $0x8] sm:$0xff] %vm243_vm1, %v236_v8  ;;  %v230_v11 = vmul.f32 0.6931472, %v328_v9 }
 0x21d   :  { %v220_v13 = vmul.f32 0.6931472, %v330_v10 }
 0x21e   :  { %v216_v12 = vpop.xlane.xlu0 %215  ;;  %v240_v14 = vsub.f32 %v408_v33, %v230_v11 }
 0x21f   :  { %339 = vlog2.f32 %v216_v12  ;;  %v332_v15 = vpop.eup %331  ;;  %v235_v16 = vsub.f32 %v416_v40, %v220_v13 }
 0x220   :  { %v334_v17 = vpop.eup %333  ;;  %249 = vst.msk [vmem:[%s475_s3 + $0x28] sm:$0xff] %vm243_vm1, %v240_v14  ;;  %v226_v18 = vmul.f32 0.6931472, %v332_v15 }
 0x221   :  { %244 = vst.msk [vmem:[%s475_s3] sm:$0xff] %vm243_vm1, %v235_v16  ;;  %v228_v19 = vmul.f32 0.6931472, %v334_v17 }
 0x222   :  { %v238_v20 = vsub.f32 %v414_v39, %v226_v18 }
 0x223   :  { %v239_v22 = vsub.f32 %v420_v45, %v228_v19 }
 0x224   :  { %v336_v21 = vpop.eup %335  ;;  %247 = vst.msk [vmem:[%s475_s3 + $0x18] sm:$0xff] %vm243_vm1, %v238_v20 }
 0x225   :  { %v338_v23 = vpop.eup %337  ;;  %v234_v24 = vmul.f32 0.6931472, %v336_v21  ;;  %248 = vst.msk [vmem:[%s475_s3 + $0x20] sm:$0xff] %vm243_vm1, %v239_v22 }
 0x226   :  { %v224_v25 = vmul.f32 0.6931472, %v338_v23 }
 0x227   :  { %v242_v26 = vsub.f32 %v425_v50, %v234_v24 }
 0x228   :  { %v237_v28 = vsub.f32 %v422_v46, %v224_v25 }
 0x229   :  { %v340_v27 = vpop.eup %339  ;;  %251 = vst.msk [vmem:[%s475_s3 + $0x38] sm:$0xff] %vm243_vm1, %v242_v26 }
 0x22a   :  { %v232_v29 = vmul.f32 0.6931472, %v340_v27  ;;  %246 = vst.msk [vmem:[%s475_s3 + $0x10] sm:$0xff] %vm243_vm1, %v237_v28 }
 0x22c   :  { %v241_v30 = vsub.f32 %v428_v52, %v232_v29 }
 0x22e   :  { %250 = vst.msk [vmem:[%s475_s3 + $0x30] sm:$0xff] %vm243_vm1, %v241_v30 }

// kernel: tpu_custom_call.1
= control target key start
LH: loop header
LB: loop body
LE: loop exit
PB: predicated region body
PF: predicated region fallthrough
CT: control target
= control target key end

     0   :  { %vm33_vm0 = vcmask 261120   ;;  %vm243_vm1 = vcmask 130048   ;;  %s472_s1 = inlined_call_operand.vmem [shape: f32[32,128], index: 1, kind: input, shape index: {}]   ;;  %s473_s0 = inlined_call_operand.vmem [shape: f32[64,32], index: 0, kind: input, shape index: {}]   ;;  %s474_s2 = inlined_call_operand.vmem [shape: f32[1,128], index: 2, kind: input, shape index: {}]   ;;  %s475_s3 = inlined_call_operand.vmem [shape: f32[64,16], index: 3, kind: output, shape index: {}]  }
   0x1   :  { %v22_v0 = vld [vmem:[%s472_s1] sm:$0xff]  ;;  %v23_v1 = vld [vmem:[%s472_s1 + $0x8] sm:$0xff]  ;;  %v24_v2 = vld [vmem:[%s472_s1 + $0x10] sm:$0xff] }
   0x2   :  { %v297_v3 = vpack.c.bf16 %v23_v1, %v22_v0  ;;  %v25_v4 = vld [vmem:[%s472_s1 + $0x18] sm:$0xff]  ;;  %v14_v5 = vld [vmem:[%s473_s0] sm:$0xff]  ;;  %v15_v8 = vld [vmem:[%s473_s0 + $0x8] sm:$0xff] }
   0x3   :  { %v18_v6 = vld [vmem:[%s473_s0 + $0x20] sm:$0xff]  ;;  %v301_v7 = vpack.c.bf16 %v25_v4, %v24_v2  ;;  %285 = vmatprep.mubr.msk.f32.mxu0 %vm33_vm0, %v14_v5  ;;  %v19_v9 = vld [vmem:[%s473_s0 + $0x28] sm:$0xff]  ;;  %v16_v10 = vld [vmem:[%s473_s0 + $0x10] sm:$0xff] }
   0x4   :  { %291 = vmatprep.mubr.msk.f32.mxu1 %vm33_vm0, %v18_v6  ;;  %298 = vmatprep.subr.bf16.mxu0 %v297_v3  ;;  %v20_v11 = vld [vmem:[%s473_s0 + $0x30] sm:$0xff]  ;;  %v17_v12 = vld [vmem:[%s473_s0 + $0x18] sm:$0xff]  ;;  %v256_v14 = vld [vmem:[%s474_s2] ss:$0 sm:$0xff] }
   0x5   :  { %305 = vmatprep.subr.bf16.mxu1 %v297_v3  ;;  %300 = vmatpush3.bf16.msra.mxu0 %v297_v3  ;;  %v21_v13 = vld [vmem:[%s473_s0 + $0x38] sm:$0xff] }
   0x6   :  { %307 = vmatpush3.bf16.msra.mxu1 %v297_v3  ;;  %302 = vmatprep.subr.bf16.mxu0 %v301_v7 }
   0x7   :  { %306 = vmatprep.subr.bf16.mxu1 %v301_v7 }
   0x9   :  { %304 = vmatpush3.bf16.msra.mxu0 %v301_v7 }
   0xa   :  { %308 = vmatpush3.bf16.msra.mxu1 %v301_v7 }
   0xc   :  { %286 = vmatmul.mubr.msk.f32.vlgmr.msra.gmra.mrb[0].mxu0 %vm33_vm0, %v15_v8 }
   0xd   :  { %292 = vmatmul.mubr.msk.f32.vlgmr.msra.gmra.mrb[0].mxu1 %vm33_vm0, %v19_v9  ;;  %288 = vmatprep.mubr.msk.f32.mxu0 %vm33_vm0, %v16_v10 }
   0xe   :  { %294 = vmatprep.mubr.msk.f32.mxu1 %vm33_vm0, %v20_v11 }
  0x10   :  { %289 = vmatmul.mubr.msk.f32.gmra.mrb[2].mxu0 %vm33_vm0, %v17_v12 }
  0x11   :  { %295 = vmatmul.mubr.msk.f32.gmra.mrb[2].mxu1 %vm33_vm0, %v21_v13 }
  0xdf   :  { %v287_v15 = vpop.f32.mrb[0].mxu0 }
  0xe0   :  { %v293_v16 = vpop.f32.mrb[0].mxu1  ;;  %v130_v17 = vadd.f32 %v287_v15, %v256_v14  ;;  %v124_v19 = vpop.f32.mrb[1].mxu0 }
  0xe1   :  { %v150_v18 = vadd.f32 %v293_v16, %v256_v14  ;;  %v144_v20 = vpop.f32.mrb[1].mxu1  ;;  %v125_v23 = vadd.f32 %v256_v14, %v124_v19 }
  0xe2   :  { %165 = vmax.xlane.f32.xlu0 %v130_v17  ;;  %v145_v28 = vadd.f32 %v256_v14, %v144_v20 }
  0xe3   :  { %173 = vmax.xlane.f32.xlu1 %v150_v18  ;;  %v290_v21 = vpop.f32.mrb[2].mxu0 }
  0xe4   :  { %v296_v22 = vpop.f32.mrb[2].mxu1  ;;  %v140_v24 = vadd.f32 %v290_v21, %v256_v14  ;;  %v134_v25 = vpop.f32.mrb[3].mxu0 }
  0xe5   :  { %v154_v26 = vpop.f32.mrb[3].mxu1  ;;  %v135_v27 = vadd.f32 %v256_v14, %v134_v25  ;;  %v160_v29 = vadd.f32 %v296_v22, %v256_v14 }
  0xe6   :  { %163 = vmax.xlane.f32.xlu0 %v125_v23  ;;  %v155_v30 = vadd.f32 %v256_v14, %v154_v26 }
  0xe7   :  { %169 = vmax.xlane.f32.xlu1 %v140_v24 }
  0xea   :  { %171 = vmax.xlane.f32.xlu0 %v145_v28 }
  0xeb   :  { %167 = vmax.xlane.f32.xlu1 %v135_v27 }
  0xee   :  { %175 = vmax.xlane.f32.xlu0 %v155_v30 }
  0xef   :  { %177 = vmax.xlane.f32.xlu1 %v160_v29 }
 0x16f   :  { %v166_v32 = vpop.xlane.xlu0 %165 }
 0x170   :  { %v174_v31 = vpop.xlane.xlu1 %173  ;;  %v410_v34 = vsub.f32 %v130_v17, %v166_v32 }
 0x171   :  { %v408_v33 = vsub.f32 %v150_v18, %v174_v31 }
 0x172   :  { %v189_v35 = vmul.f32 1.442695, %v410_v34 }
 0x173   :  { %v164_v37 = vpop.xlane.xlu0 %163  ;;  %v197_v38 = vmul.f32 1.442695, %v408_v33 }
 0x174   :  { %v170_v36 = vpop.xlane.xlu1 %169  ;;  %v416_v40 = vsub.f32 %v125_v23, %v164_v37  ;;  %309 = vpow2.f32 %v189_v35 }
 0x175   :  { %v414_v39 = vsub.f32 %v140_v24, %v170_v36  ;;  %311 = vpow2.f32 %v197_v38 }
 0x176   :  { %v187_v41 = vmul.f32 1.442695, %v416_v40 }
 0x177   :  { %v172_v43 = vpop.xlane.xlu0 %171  ;;  %v193_v44 = vmul.f32 1.442695, %v414_v39 }
 0x178   :  { %v168_v42 = vpop.xlane.xlu1 %167  ;;  %v420_v45 = vsub.f32 %v145_v28, %v172_v43  ;;  %313 = vpow2.f32 %v187_v41 }
 0x179   :  { %v422_v46 = vsub.f32 %v135_v27, %v168_v42  ;;  %315 = vpow2.f32 %v193_v44 }
 0x17a   :  { %v195_v47 = vmul.f32 1.442695, %v420_v45 }
 0x17b   :  { %v176_v49 = vpop.xlane.xlu0 %175  ;;  %v191_v51 = vmul.f32 1.442695, %v422_v46 }
 0x17c   :  { %v178_v48 = vpop.xlane.xlu1 %177  ;;  %317 = vpow2.f32 %v195_v47  ;;  %v428_v52 = vsub.f32 %v155_v30, %v176_v49 }
 0x17d   :  { %v425_v50 = vsub.f32 %v160_v29, %v178_v48 }
 0x17e   :  { %v310_v54 = vpop.eup %309  ;;  %v199_v55 = vmul.f32 1.442695, %v428_v52 }
 0x17f   :  { %v201_v53 = vmul.f32 1.442695, %v425_v50  ;;  %205 = vadd.xlane.f32.xlu1 %v310_v54  ;;  %v312_v56 = vpop.eup %311 }
 0x181   :  { %319 = vpow2.f32 %v201_v53 }
 0x182   :  { %321 = vpow2.f32 %v191_v51  ;;  %v314_v57 = vpop.eup %313 }
 0x183   :  { %213 = vadd.xlane.f32.xlu1 %v312_v56  ;;  %203 = vadd.xlane.f32.xlu0 %v314_v57  ;;  %323 = vpow2.f32 %v199_v55  ;;  %v316_v58 = vpop.eup %315 }
 0x186   :  { %v318_v59 = vpop.eup %317 }
 0x187   :  { %209 = vadd.xlane.f32.xlu1 %v316_v58  ;;  %211 = vadd.xlane.f32.xlu0 %v318_v59 }
 0x18b   :  { %v320_v60 = vpop.eup %319 }
 0x18c   :  { %v322_v61 = vpop.eup %321  ;;  %217 = vadd.xlane.f32.xlu1 %v320_v60 }
 0x18d   :  { %207 = vadd.xlane.f32.xlu0 %v322_v61  ;;  %v324_v62 = vpop.eup %323 }
 0x191   :  { %215 = vadd.xlane.f32.xlu0 %v324_v62 }
 0x20c   :  { %v206_v63 = vpop.xlane.xlu1 %205 }
 0x20d   :  { %325 = vlog2.f32 %v206_v63 }
 0x210   :  { %v214_v0 = vpop.xlane.xlu1 %213  ;;  %v204_v1 = vpop.xlane.xlu0 %203 }
 0x211   :  { %327 = vlog2.f32 %v214_v0 }
 0x212   :  { %329 = vlog2.f32 %v204_v1 }
 0x214   :  { %v210_v2 = vpop.xlane.xlu1 %209  ;;  %v212_v3 = vpop.xlane.xlu0 %211 }
 0x215   :  { %331 = vlog2.f32 %v210_v2 }
 0x216   :  { %333 = vlog2.f32 %v212_v3 }
 0x217   :  { %v326_v4 = vpop.eup %325 }
 0x218   :  { %v222_v5 = vmul.f32 0.6931472, %v326_v4 }
 0x219   :  { %v218_v6 = vpop.xlane.xlu1 %217 }
 0x21a   :  { %v208_v7 = vpop.xlane.xlu0 %207  ;;  %335 = vlog2.f32 %v218_v6  ;;  %v236_v8 = vsub.f32 %v410_v34, %v222_v5 }
 0x21b   :  { %337 = vlog2.f32 %v208_v7  ;;  %v328_v9 = vpop.eup %327 }
 0x21c   :  { %v330_v10 = vpop.eup %329  ;;  %245 = vst.msk [vmem:[%s475_s3 + $0x8] sm:$0xff] %vm243_vm1, %v236_v8  ;;  %v230_v11 = vmul.f32 0.6931472, %v328_v9 }
 0x21d   :  { %v220_v13 = vmul.f32 0.6931472, %v330_v10 }
 0x21e   :  { %v216_v12 = vpop.xlane.xlu0 %215  ;;  %v240_v14 = vsub.f32 %v408_v33, %v230_v11 }
 0x21f   :  { %339 = vlog2.f32 %v216_v12  ;;  %v332_v15 = vpop.eup %331  ;;  %v235_v16 = vsub.f32 %v416_v40, %v220_v13 }
 0x220   :  { %v334_v17 = vpop.eup %333  ;;  %249 = vst.msk [vmem:[%s475_s3 + $0x28] sm:$0xff] %vm243_vm1, %v240_v14  ;;  %v226_v18 = vmul.f32 0.6931472, %v332_v15 }
 0x221   :  { %244 = vst.msk [vmem:[%s475_s3] sm:$0xff] %vm243_vm1, %v235_v16  ;;  %v228_v19 = vmul.f32 0.6931472, %v334_v17 }
 0x222   :  { %v238_v20 = vsub.f32 %v414_v39, %v226_v18 }
 0x223   :  { %v239_v22 = vsub.f32 %v420_v45, %v228_v19 }
 0x224   :  { %v336_v21 = vpop.eup %335  ;;  %247 = vst.msk [vmem:[%s475_s3 + $0x18] sm:$0xff] %vm243_vm1, %v238_v20 }
 0x225   :  { %v338_v23 = vpop.eup %337  ;;  %v234_v24 = vmul.f32 0.6931472, %v336_v21  ;;  %248 = vst.msk [vmem:[%s475_s3 + $0x20] sm:$0xff] %vm243_vm1, %v239_v22 }
 0x226   :  { %v224_v25 = vmul.f32 0.6931472, %v338_v23 }
 0x227   :  { %v242_v26 = vsub.f32 %v425_v50, %v234_v24 }
 0x228   :  { %v237_v28 = vsub.f32 %v422_v46, %v224_v25 }
 0x229   :  { %v340_v27 = vpop.eup %339  ;;  %251 = vst.msk [vmem:[%s475_s3 + $0x38] sm:$0xff] %vm243_vm1, %v242_v26 }
 0x22a   :  { %v232_v29 = vmul.f32 0.6931472, %v340_v27  ;;  %246 = vst.msk [vmem:[%s475_s3 + $0x10] sm:$0xff] %vm243_vm1, %v237_v28 }
 0x22c   :  { %v241_v30 = vsub.f32 %v428_v52, %v232_v29 }
 0x22e   :  { %250 = vst.msk [vmem:[%s475_s3 + $0x30] sm:$0xff] %vm243_vm1, %v241_v30 }

</bundles_post_ra>
